<compile_context>
chip_gen: v5e
topology: v5e:2x2
jax: 0.10.0
libtpu: 0.0.40
codegen_flags: <defaults>
</compile_context>

<pallas_src>
import functools

import jax
import jax.numpy as jnp
from jax import lax
from jax.experimental import pallas as pl
from jax.experimental.pallas import tpu as pltpu


def _round_up(x, m):
    return (x + m - 1) // m * m


def _interp_matrix(out_size, in_size):
    """Bilinear interpolation matrix (out_size, in_size), align_corners=True."""
    if out_size == 1:
        src = jnp.zeros((1,), jnp.float32)
    else:
        src = jnp.arange(out_size, dtype=jnp.float32) * (in_size - 1) / (out_size - 1)
    i0 = jnp.clip(jnp.floor(src).astype(jnp.int32), 0, in_size - 1)
    i1 = jnp.clip(i0 + 1, 0, in_size - 1)
    w1 = src - i0.astype(jnp.float32)
    w0 = 1.0 - w1
    cols = jnp.arange(in_size)
    return (w0[:, None] * (cols[None, :] == i0[:, None])
            + w1[:, None] * (cols[None, :] == i1[:, None])).astype(jnp.float32)


# ----------------------------------------------------------------------------
# Fused kernel: down convs + upsample + 3x3 flow conv + flow_warp, per batch elem
# ----------------------------------------------------------------------------
def _aligned_kernel(high_ref, lowp_ref, wdh_ref, wdl_ref, mpt_ref, wconv_ref,
                    base_ref, o_ref, *, in_h, in_w, out_h, out_w):
    Wp = out_w + 2                    # padded row stride
    Q = out_h * Wp                    # padded-flat output pixels (cols >= out_w unused)

    hf = high_ref[0]                  # (inplane, in_h*in_w)   pixels on lanes
    lf = lowp_ref[0]                  # (inplane, L)           padded-flat, lanes

    # --- 1x1 down convs: tiny channel matmuls at native resolution -----------------
    hd = jnp.dot(wdh_ref[...], hf, preferred_element_type=jnp.float32)   # (op_p, in_h*in_w)
    ld = jnp.dot(wdl_ref[...], lf, preferred_element_type=jnp.float32)   # (op_p, L)

    # --- bilinear upsample (align_corners=True), output already in padded-flat layout
    hu = jnp.dot(hd, mpt_ref[...], preferred_element_type=jnp.float32)   # (op_p, L)

    # --- cat([upsampled high_d, low_d], channel axis); both pieces 8-aligned --------
    cat = jnp.concatenate([hu, ld], axis=0)                               # (2*op_p, L)

    # --- 3x3 'same' conv as ONE matmul: (2, 9*C) @ (9*C, Q) -------------------------
    # tap (ky, kx) of output pixel q = r*Wp + c lives at flat index q + ky*Wp + kx
    slabs = [cat[:, ky * Wp + kx: ky * Wp + kx + Q]
             for ky in range(3) for kx in range(3)]                       # lane shifts
    patch = jnp.concatenate(slabs, axis=0)                                # (9*2*op_p, Q)
    flow = jnp.dot(wconv_ref[...], patch, preferred_element_type=jnp.float32)  # (2, Q)

    # --- flow_warp == grid_sample(bilinear, zeros padding, align_corners=False) -----
    base = base_ref[...]                                                  # (2, Q) ix/iy base
    ix = base[0:1, :] + flow[0:1, :] * (in_w / (2.0 * out_w))
    iy = base[1:2, :] + flow[1:2, :] * (in_h / (2.0 * out_h))
    x0f = jnp.floor(ix)
    y0f = jnp.floor(iy)
    wx1 = ix - x0f
    wx0 = 1.0 - wx1
    wy1 = iy - y0f
    wy0 = 1.0 - wy1
    x0 = x0f.astype(jnp.int32)
    x1 = x0 + 1
    y0 = y0f.astype(jnp.int32)
    y1 = y0 + 1

    # one-hot interpolation masks; out-of-range corners match no row -> zeros padding
    yq = lax.broadcasted_iota(jnp.int32, (in_h, Q), 0)
    xq = lax.broadcasted_iota(jnp.int32, (in_w, Q), 0)
    syT = wy0 * (yq == y0).astype(jnp.float32) + wy1 * (yq == y1).astype(jnp.float32)
    sxT = wx0 * (xq == x0).astype(jnp.float32) + wx1 * (xq == x1).astype(jnp.float32)
    # combined mask[(y, x), q] = syT[y, q] * sxT[x, q]
    mask = (syT[:, None, :] * sxT[None, :, :]).reshape(in_h * in_w, Q)

    # one MXU matmul gathers and blends all 4 corners for every channel
    o_ref[0] = jnp.dot(hf, mask, preferred_element_type=jnp.float32)      # (inplane, Q)


# ----------------------------------------------------------------------------
# Full forward (AlignedModule.forward)
# ----------------------------------------------------------------------------
def aligned_module_forward(low_nchw, high_nchw, w_down_l, w_down_h, w_flow):
    N, inplane, Hl, Wl = low_nchw.shape
    _, _, Hh, Wh = high_nchw.shape
    outplane = w_down_h.shape[0]

    op_p = _round_up(outplane, 8)       # down-conv output channels padded to sublane tile
    Wp = Wl + 2                         # padded row stride
    L = (Hl + 3) * Wp                   # 1 pad row above, 2 below -> covers all tap slices
    Q = Hl * Wp                         # padded-flat output pixel count
    Qh = Hh * Wh

    # ---- cheap XLA glue: free reshapes + one small zero-pad of `low` --------------
    high_flat = high_nchw.astype(jnp.float32).reshape(N, inplane, Qh)
    low_pad = jnp.pad(low_nchw.astype(jnp.float32), ((0, 0), (0, 0), (1, 2), (1, 1)))
    low_pad_flat = low_pad.reshape(N, inplane, L)

    # 1x1 conv weights, rows zero-padded to op_p
    wdh = jnp.pad(w_down_h[:, :, 0, 0].astype(jnp.float32),
                  ((0, op_p - outplane), (0, 0)))                   # (op_p, inplane)
    wdl = jnp.pad(w_down_l[:, :, 0, 0].astype(jnp.float32),
                  ((0, op_p - outplane), (0, 0)))                   # (op_p, inplane)

    # combined bilinear-upsample matrix (align_corners=True) mapped into the
    # zero-padded flat output layout (zero columns at the spatial padding positions)
    ah = _interp_matrix(Hl, Hh)                                     # (Hl, Hh)
    aw = _interp_matrix(Wl, Wh)                                     # (Wl, Wh)
    m4 = ah.T[:, None, :, None] * aw.T[None, :, None, :]            # (Hh, Wh, Hl, Wl)
    m4 = jnp.pad(m4, ((0, 0), (0, 0), (1, 2), (1, 1)))              # (Hh, Wh, Hl+3, Wp)
    m_padT = m4.reshape(Qh, L)

    # 3x3 conv weight rearranged to (2, 9 * 2*op_p), channel blocks matching `cat`
    wt = jnp.transpose(w_flow.astype(jnp.float32), (2, 3, 1, 0))    # (3, 3, 2*outplane, 2)
    wt_h = jnp.pad(wt[:, :, :outplane, :], ((0, 0), (0, 0), (0, op_p - outplane), (0, 0)))
    wt_l = jnp.pad(wt[:, :, outplane:, :], ((0, 0), (0, 0), (0, op_p - outplane), (0, 0)))
    wconv = jnp.concatenate([wt_h, wt_l], axis=2).reshape(9 * 2 * op_p, 2).T  # (2, 9*2*op_p)

    # per-pixel base sampling coordinates (grid_sample unnormalization pre-folded)
    wden = float(max(Wl - 1, 1))
    hden = float(max(Hl - 1, 1))
    col = jnp.arange(Wp, dtype=jnp.float32)
    row = jnp.arange(Hl, dtype=jnp.float32)
    ixb = (((-1.0 + 2.0 * col / wden) + 1.0) * Wh - 1.0) * 0.5      # (Wp,)
    iyb = (((-1.0 + 2.0 * row / hden) + 1.0) * Hh - 1.0) * 0.5      # (Hl,)
    base = jnp.stack(
        [jnp.broadcast_to(ixb[None, :], (Hl, Wp)).reshape(Q),
         jnp.broadcast_to(iyb[:, None], (Hl, Wp)).reshape(Q)], axis=0)  # (2, Q)

    kern = functools.partial(_aligned_kernel, in_h=Hh, in_w=Wh, out_h=Hl, out_w=Wl)
    out_flat = pl.pallas_call(
        kern,
        out_shape=jax.ShapeDtypeStruct((N, inplane, Q), jnp.float32),
        grid=(N,),
        in_specs=[
            pl.BlockSpec((1, inplane, Qh), lambda n: (n, 0, 0)),    # high (warp src + down_h)
            pl.BlockSpec((1, inplane, L), lambda n: (n, 0, 0)),     # low, padded-flat
            pl.BlockSpec((op_p, inplane), lambda n: (0, 0)),        # w_down_h
            pl.BlockSpec((op_p, inplane), lambda n: (0, 0)),        # w_down_l
            pl.BlockSpec((Qh, L), lambda n: (0, 0)),                # upsample matrix
            pl.BlockSpec((2, 9 * 2 * op_p), lambda n: (0, 0)),      # 3x3 conv weights
            pl.BlockSpec((2, Q), lambda n: (0, 0)),                 # base sampling coords
        ],
        out_specs=pl.BlockSpec((1, inplane, Q), lambda n: (n, 0, 0)),
        compiler_params=pltpu.CompilerParams(
            dimension_semantics=("parallel",),
            vmem_limit_bytes=32 * 1024 * 1024),
    )(high_flat, low_pad_flat, wdh, wdl, m_padT, wconv, base)

    # drop the two garbage columns of the padded-flat layout (free reshape + one slice)
    return out_flat.reshape(N, inplane, Hl, Wp)[:, :, :, :Wl]


# ----------------------------------------------------------------------------
# Pure-JAX reference (independent, gather-based) for verification
# ----------------------------------------------------------------------------
def ref_forward(low, high, w_down_l, w_down_h, w_flow):
    dn = ('NCHW', 'OIHW', 'NCHW')
    hp = lax.Precision.HIGHEST
    Hl, Wl = low.shape[2], low.shape[3]
    low_d = lax.conv_general_dilated(low, w_down_l, (1, 1), 'VALID',
                                     dimension_numbers=dn, precision=hp)
    high_d = lax.conv_general_dilated(high, w_down_h, (1, 1), 'VALID',
                                      dimension_numbers=dn, precision=hp)

    def up(x, out_h, out_w):   # bilinear, align_corners=True
        _, _, Hin, Win = x.shape
        sy = jnp.arange(out_h, dtype=jnp.float32) * (Hin - 1) / (out_h - 1)
        sx = jnp.arange(out_w, dtype=jnp.float32) * (Win - 1) / (out_w - 1)
        y0 = jnp.clip(jnp.floor(sy).astype(jnp.int32), 0, Hin - 1)
        y1 = jnp.clip(y0 + 1, 0, Hin - 1)
        x0 = jnp.clip(jnp.floor(sx).astype(jnp.int32), 0, Win - 1)
        x1 = jnp.clip(x0 + 1, 0, Win - 1)
        wy1 = (sy - y0.astype(jnp.float32))[:, None]
        wy0 = 1.0 - wy1
        wx1 = (sx - x0.astype(jnp.float32))[None, :]
        wx0 = 1.0 - wx1
        g = lambda yi, xi: x[:, :, yi[:, None], xi[None, :]]
        return (wy0 * wx0 * g(y0, x0) + wy0 * wx1 * g(y0, x1)
                + wy1 * wx0 * g(y1, x0) + wy1 * wx1 * g(y1, x1))

    high_up = up(high_d, Hl, Wl)
    cat = jnp.concatenate([high_up, low_d], axis=1)
    flow = lax.conv_general_dilated(cat, w_flow, (1, 1), ((1, 1), (1, 1)),
                                    dimension_numbers=dn, precision=hp)

    gx = jnp.broadcast_to(jnp.linspace(-1.0, 1.0, Wl)[None, :], (Hl, Wl))
    gy = jnp.broadcast_to(jnp.linspace(-1.0, 1.0, Hl)[:, None], (Hl, Wl))
    grid = jnp.stack([gx, gy], axis=-1)[None]
    norm = jnp.array([Wl, Hl], dtype=jnp.float32)
    grid = grid + jnp.transpose(flow, (0, 2, 3, 1)) / norm

    N, C, Hin, Win = high.shape
    ix = ((grid[..., 0] + 1.0) * Win - 1.0) / 2.0
    iy = ((grid[..., 1] + 1.0) * Hin - 1.0) / 2.0
    x0 = jnp.floor(ix).astype(jnp.int32)
    y0 = jnp.floor(iy).astype(jnp.int32)
    x1, y1 = x0 + 1, y0 + 1
    wx1 = ix - x0.astype(jnp.float32)
    wx0 = 1.0 - wx1
    wy1 = iy - y0.astype(jnp.float32)
    wy0 = 1.0 - wy1
    n_idx = jnp.arange(N)[:, None, None, None]
    c_idx = jnp.arange(C)[None, :, None, None]

    def gather(yi, xi):
        valid = (xi >= 0) & (xi < Win) & (yi >= 0) & (yi < Hin)
        yc = jnp.clip(yi, 0, Hin - 1)
        xc = jnp.clip(xi, 0, Win - 1)
        v = high[n_idx, c_idx, yc[:, None, :, :], xc[:, None, :, :]]
        return v * valid[:, None, :, :].astype(high.dtype)

    return (gather(y0, x0) * (wy0 * wx0)[:, None]
            + gather(y0, x1) * (wy0 * wx1)[:, None]
            + gather(y1, x0) * (wy1 * wx0)[:, None]
            + gather(y1, x1) * (wy1 * wx1)[:, None])


# ----------------------------------------------------------------------------
if __name__ == "__main__":
    key = jax.random.PRNGKey(0)
    k1, k2, k3, k4, k5 = jax.random.split(key, 5)

    N, inplane, outplane = 2, 4, 4
    Hl = Wl = 16     # low_feature spatial size (output size)
    Hh = Wh = 8      # h_feature spatial size

    # Deterministic synthetic parameters (Conv2d weight layouts: OIHW, bias=False)
    w_down_h = 0.2 * jax.random.normal(k1, (outplane, inplane, 1, 1), jnp.float32)
    w_down_l = 0.2 * jax.random.normal(k2, (outplane, inplane, 1, 1), jnp.float32)
    w_flow = 0.3 * jax.random.normal(k3, (2, outplane * 2, 3, 3), jnp.float32)

    low_feature = jax.random.normal(k4, (N, inplane, Hl, Wl), jnp.float32)
    h_feature = jax.random.normal(k5, (N, inplane, Hh, Wh), jnp.float32)

    out = jax.jit(aligned_module_forward)(low_feature, h_feature,
                                          w_down_l, w_down_h, w_flow)
    out = jax.block_until_ready(out)

    ref = ref_forward(low_feature, h_feature, w_down_l, w_down_h, w_flow)
    assert out.shape == (N, inplane, Hl, Wl), out.shape
    err = float(jnp.max(jnp.abs(out - ref)))
    assert err < 1e-4, f"max abs err too large: {err}"

    print("KERNEL_OK")
</pallas_src>

<mosaic_0001>
module attributes {stable_mosaic.version = 11 : i64} {
  func.func @_aligned_kernel(%arg0: i32, %arg1: memref<1x4x64xf32, #tpu.memory_space<vmem>>, %arg2: memref<1x4x342xf32, #tpu.memory_space<vmem>>, %arg3: memref<8x4xf32, #tpu.memory_space<vmem>>, %arg4: memref<8x4xf32, #tpu.memory_space<vmem>>, %arg5: memref<64x342xf32, #tpu.memory_space<vmem>>, %arg6: memref<2x144xf32, #tpu.memory_space<vmem>>, %arg7: memref<2x288xf32, #tpu.memory_space<vmem>>, %arg8: memref<1x4x288xf32, #tpu.memory_space<vmem>>) attributes {dimension_semantics = [#tpu.dimension_semantics<parallel>], iteration_bounds = array<i64: 2>, scalar_prefetch = 0 : i64, scratch_operands = 0 : i64, tpu.core_type = #tpu.core_type<tc>, window_params = [{transform_indices = @transform_0, window_bounds = array<i64: 1, 4, 64>}, {transform_indices = @transform_1, window_bounds = array<i64: 1, 4, 342>}, {pipeline_mode = #tpu.pipeline_mode<synchronous>, transform_indices = @transform_2, window_bounds = array<i64: 8, 4>}, {pipeline_mode = #tpu.pipeline_mode<synchronous>, transform_indices = @transform_3, window_bounds = array<i64: 8, 4>}, {pipeline_mode = #tpu.pipeline_mode<synchronous>, transform_indices = @transform_4, window_bounds = array<i64: 64, 342>}, {pipeline_mode = #tpu.pipeline_mode<synchronous>, transform_indices = @transform_5, window_bounds = array<i64: 2, 144>}, {pipeline_mode = #tpu.pipeline_mode<synchronous>, transform_indices = @transform_6, window_bounds = array<i64: 2, 288>}, {transform_indices = @transform_7, window_bounds = array<i64: 1, 4, 288>}]} {
    %c0 = arith.constant 0 : index
    %c0_0 = arith.constant 0 : index
    %c0_1 = arith.constant 0 : index
    %0 = vector.load %arg1[%c0, %c0_0, %c0_1] : memref<1x4x64xf32, #tpu.memory_space<vmem>>, vector<1x4x64xf32>
    %1 = vector.shape_cast %0 : vector<1x4x64xf32> to vector<4x64xf32>
    %c0_2 = arith.constant 0 : index
    %c0_3 = arith.constant 0 : index
    %c0_4 = arith.constant 0 : index
    %2 = vector.load %arg2[%c0_2, %c0_3, %c0_4] : memref<1x4x342xf32, #tpu.memory_space<vmem>>, vector<1x4x342xf32>
    %3 = vector.shape_cast %2 : vector<1x4x342xf32> to vector<4x342xf32>
    %c0_5 = arith.constant 0 : index
    %c0_6 = arith.constant 0 : index
    %4 = vector.load %arg3[%c0_5, %c0_6] : memref<8x4xf32, #tpu.memory_space<vmem>>, vector<8x4xf32>
    %cst = arith.constant dense<0.000000e+00> : vector<8x64xf32>
    %5 = tpu.matmul %4, %1, %cst {dimension_numbers = #tpu.dot_dimension_numbers<[1], [0], [0], [1], [0, 0, 1, 1], [], []>} : vector<8x4xf32>, vector<4x64xf32>, vector<8x64xf32> -> vector<8x64xf32>
    %c0_7 = arith.constant 0 : index
    %c0_8 = arith.constant 0 : index
    %6 = vector.load %arg4[%c0_7, %c0_8] : memref<8x4xf32, #tpu.memory_space<vmem>>, vector<8x4xf32>
    %cst_9 = arith.constant dense<0.000000e+00> : vector<8x342xf32>
    %7 = tpu.matmul %6, %3, %cst_9 {dimension_numbers = #tpu.dot_dimension_numbers<[1], [0], [0], [1], [0, 0, 1, 1], [], []>} : vector<8x4xf32>, vector<4x342xf32>, vector<8x342xf32> -> vector<8x342xf32>
    %c0_10 = arith.constant 0 : index
    %c0_11 = arith.constant 0 : index
    %8 = vector.load %arg5[%c0_10, %c0_11] : memref<64x342xf32, #tpu.memory_space<vmem>>, vector<64x342xf32>
    %cst_12 = arith.constant dense<0.000000e+00> : vector<8x342xf32>
    %9 = tpu.matmul %5, %8, %cst_12 {dimension_numbers = #tpu.dot_dimension_numbers<[1], [0], [0], [1], [0, 0, 1, 1], [], []>} : vector<8x64xf32>, vector<64x342xf32>, vector<8x342xf32> -> vector<8x342xf32>
    %10 = tpu.concatenate %9, %7 in 0 : vector<8x342xf32>, vector<8x342xf32> -> vector<16x342xf32>
    %11 = vector.extract_strided_slice %10 {offsets = [0, 0], sizes = [16, 288], strides = [1, 1]} : vector<16x342xf32> to vector<16x288xf32>
    %12 = vector.extract_strided_slice %10 {offsets = [0, 1], sizes = [16, 288], strides = [1, 1]} : vector<16x342xf32> to vector<16x288xf32>
    %13 = vector.extract_strided_slice %10 {offsets = [0, 2], sizes = [16, 288], strides = [1, 1]} : vector<16x342xf32> to vector<16x288xf32>
    %14 = vector.extract_strided_slice %10 {offsets = [0, 18], sizes = [16, 288], strides = [1, 1]} : vector<16x342xf32> to vector<16x288xf32>
    %15 = vector.extract_strided_slice %10 {offsets = [0, 19], sizes = [16, 288], strides = [1, 1]} : vector<16x342xf32> to vector<16x288xf32>
    %16 = vector.extract_strided_slice %10 {offsets = [0, 20], sizes = [16, 288], strides = [1, 1]} : vector<16x342xf32> to vector<16x288xf32>
    %17 = vector.extract_strided_slice %10 {offsets = [0, 36], sizes = [16, 288], strides = [1, 1]} : vector<16x342xf32> to vector<16x288xf32>
    %18 = vector.extract_strided_slice %10 {offsets = [0, 37], sizes = [16, 288], strides = [1, 1]} : vector<16x342xf32> to vector<16x288xf32>
    %19 = vector.extract_strided_slice %10 {offsets = [0, 38], sizes = [16, 288], strides = [1, 1]} : vector<16x342xf32> to vector<16x288xf32>
    %20 = tpu.concatenate %11, %12, %13, %14, %15, %16, %17, %18, %19 in 0 : vector<16x288xf32>, vector<16x288xf32>, vector<16x288xf32>, vector<16x288xf32>, vector<16x288xf32>, vector<16x288xf32>, vector<16x288xf32>, vector<16x288xf32>, vector<16x288xf32> -> vector<144x288xf32>
    %c0_13 = arith.constant 0 : index
    %c0_14 = arith.constant 0 : index
    %21 = vector.load %arg6[%c0_13, %c0_14] : memref<2x144xf32, #tpu.memory_space<vmem>>, vector<2x144xf32>
    %cst_15 = arith.constant dense<0.000000e+00> : vector<2x288xf32>
    %22 = tpu.matmul %21, %20, %cst_15 {dimension_numbers = #tpu.dot_dimension_numbers<[1], [0], [0], [1], [0, 0, 1, 1], [], []>} : vector<2x144xf32>, vector<144x288xf32>, vector<2x288xf32> -> vector<2x288xf32>
    %c0_16 = arith.constant 0 : index
    %c0_17 = arith.constant 0 : index
    %23 = vector.load %arg7[%c0_16, %c0_17] : memref<2x288xf32, #tpu.memory_space<vmem>>, vector<2x288xf32>
    %24 = vector.extract_strided_slice %23 {offsets = [0, 0], sizes = [1, 288], strides = [1, 1]} : vector<2x288xf32> to vector<1x288xf32>
    %25 = vector.extract_strided_slice %22 {offsets = [0, 0], sizes = [1, 288], strides = [1, 1]} : vector<2x288xf32> to vector<1x288xf32>
    %cst_18 = arith.constant 2.500000e-01 : f32
    %26 = vector.broadcast %cst_18 : f32 to vector<1x288xf32>
    %27 = arith.mulf %25, %26 : vector<1x288xf32>
    %28 = arith.addf %24, %27 : vector<1x288xf32>
    %29 = vector.extract_strided_slice %23 {offsets = [1, 0], sizes = [1, 288], strides = [1, 1]} : vector<2x288xf32> to vector<1x288xf32>
    %30 = vector.extract_strided_slice %22 {offsets = [1, 0], sizes = [1, 288], strides = [1, 1]} : vector<2x288xf32> to vector<1x288xf32>
    %cst_19 = arith.constant 2.500000e-01 : f32
    %31 = vector.broadcast %cst_19 : f32 to vector<1x288xf32>
    %32 = arith.mulf %30, %31 : vector<1x288xf32>
    %33 = arith.addf %29, %32 : vector<1x288xf32>
    %34 = math.floor %28 : vector<1x288xf32>
    %35 = math.floor %33 : vector<1x288xf32>
    %36 = arith.subf %28, %34 : vector<1x288xf32>
    %cst_20 = arith.constant 1.000000e+00 : f32
    %37 = vector.broadcast %cst_20 : f32 to vector<1x288xf32>
    %38 = arith.subf %37, %36 : vector<1x288xf32>
    %39 = arith.subf %33, %35 : vector<1x288xf32>
    %cst_21 = arith.constant 1.000000e+00 : f32
    %40 = vector.broadcast %cst_21 : f32 to vector<1x288xf32>
    %41 = arith.subf %40, %39 : vector<1x288xf32>
    %42 = arith.fptosi %34 : vector<1x288xf32> to vector<1x288xi32>
    %c1_i32 = arith.constant 1 : i32
    %43 = vector.broadcast %c1_i32 : i32 to vector<1x288xi32>
    %44 = arith.addi %42, %43 : vector<1x288xi32>
    %45 = arith.fptosi %35 : vector<1x288xf32> to vector<1x288xi32>
    %c1_i32_22 = arith.constant 1 : i32
    %46 = vector.broadcast %c1_i32_22 : i32 to vector<1x288xi32>
    %47 = arith.addi %45, %46 : vector<1x288xi32>
    %48 = tpu.iota {dimensions = array<i32: 0>} : vector<8x288xi32>
    %49 = tpu.iota {dimensions = array<i32: 0>} : vector<8x288xi32>
    %50 = vector.broadcast %45 : vector<1x288xi32> to vector<8x288xi32>
    %51 = arith.cmpi eq, %48, %50 : vector<8x288xi32>
    %52 = arith.extui %51 : vector<8x288xi1> to vector<8x288xi32>
    %53 = arith.sitofp %52 : vector<8x288xi32> to vector<8x288xf32>
    %54 = vector.broadcast %41 : vector<1x288xf32> to vector<8x288xf32>
    %55 = arith.mulf %54, %53 : vector<8x288xf32>
    %56 = vector.broadcast %47 : vector<1x288xi32> to vector<8x288xi32>
    %57 = arith.cmpi eq, %48, %56 : vector<8x288xi32>
    %58 = arith.extui %57 : vector<8x288xi1> to vector<8x288xi32>
    %59 = arith.sitofp %58 : vector<8x288xi32> to vector<8x288xf32>
    %60 = vector.broadcast %39 : vector<1x288xf32> to vector<8x288xf32>
    %61 = arith.mulf %60, %59 : vector<8x288xf32>
    %62 = arith.addf %55, %61 : vector<8x288xf32>
    %63 = vector.broadcast %42 : vector<1x288xi32> to vector<8x288xi32>
    %64 = arith.cmpi eq, %49, %63 : vector<8x288xi32>
    %65 = arith.extui %64 : vector<8x288xi1> to vector<8x288xi32>
    %66 = arith.sitofp %65 : vector<8x288xi32> to vector<8x288xf32>
    %67 = vector.broadcast %38 : vector<1x288xf32> to vector<8x288xf32>
    %68 = arith.mulf %67, %66 : vector<8x288xf32>
    %69 = vector.broadcast %44 : vector<1x288xi32> to vector<8x288xi32>
    %70 = arith.cmpi eq, %49, %69 : vector<8x288xi32>
    %71 = arith.extui %70 : vector<8x288xi1> to vector<8x288xi32>
    %72 = arith.sitofp %71 : vector<8x288xi32> to vector<8x288xf32>
    %73 = vector.broadcast %36 : vector<1x288xf32> to vector<8x288xf32>
    %74 = arith.mulf %73, %72 : vector<8x288xf32>
    %75 = arith.addf %68, %74 : vector<8x288xf32>
    %76 = vector.shape_cast %62 : vector<8x288xf32> to vector<8x1x288xf32>
    %77 = vector.shape_cast %75 : vector<8x288xf32> to vector<1x8x288xf32>
    %78 = vector.broadcast %76 : vector<8x1x288xf32> to vector<8x8x288xf32>
    %79 = vector.broadcast %77 : vector<1x8x288xf32> to vector<8x8x288xf32>
    %80 = arith.mulf %78, %79 : vector<8x8x288xf32>
    %81 = vector.shape_cast %80 : vector<8x8x288xf32> to vector<64x288xf32>
    %cst_23 = arith.constant dense<0.000000e+00> : vector<4x288xf32>
    %82 = tpu.matmul %1, %81, %cst_23 {dimension_numbers = #tpu.dot_dimension_numbers<[1], [0], [0], [1], [0, 0, 1, 1], [], []>} : vector<4x64xf32>, vector<64x288xf32>, vector<4x288xf32> -> vector<4x288xf32>
    %c0_24 = arith.constant 0 : index
    %c0_25 = arith.constant 0 : index
    %c0_26 = arith.constant 0 : index
    %83 = vector.load %arg8[%c0_24, %c0_25, %c0_26] : memref<1x4x288xf32, #tpu.memory_space<vmem>>, vector<1x4x288xf32>
    %84 = vector.shape_cast %83 : vector<1x4x288xf32> to vector<4x288xf32>
    %85 = vector.shape_cast %82 : vector<4x288xf32> to vector<1x4x288xf32>
    tpu.vector_store %arg8[%c0_24, %c0_25, %c0_26], %85 {strides = array<i32>} : memref<1x4x288xf32, #tpu.memory_space<vmem>>, vector<1x4x288xf32>,
    return
  }
  func.func @transform_0(%arg0: i32) -> (i32, i32, i32) {
    %c0_i32 = arith.constant 0 : i32
    %c0_i32_0 = arith.constant 0 : i32
    %c0_i32_1 = arith.constant 0 : i32
    return %arg0, %c0_i32, %c0_i32_0 : i32, i32, i32
  }
  func.func @transform_1(%arg0: i32) -> (i32, i32, i32) {
    %c0_i32 = arith.constant 0 : i32
    %c0_i32_0 = arith.constant 0 : i32
    %c0_i32_1 = arith.constant 0 : i32
    return %arg0, %c0_i32, %c0_i32_0 : i32, i32, i32
  }
  func.func @transform_2(%arg0: i32) -> (i32, i32) {
    %c0_i32 = arith.constant 0 : i32
    %c0_i32_0 = arith.constant 0 : i32
    %c0_i32_1 = arith.constant 0 : i32
    return %c0_i32, %c0_i32_0 : i32, i32
  }
  func.func @transform_3(%arg0: i32) -> (i32, i32) {
    %c0_i32 = arith.constant 0 : i32
    %c0_i32_0 = arith.constant 0 : i32
    %c0_i32_1 = arith.constant 0 : i32
    return %c0_i32, %c0_i32_0 : i32, i32
  }
  func.func @transform_4(%arg0: i32) -> (i32, i32) {
    %c0_i32 = arith.constant 0 : i32
    %c0_i32_0 = arith.constant 0 : i32
    %c0_i32_1 = arith.constant 0 : i32
    return %c0_i32, %c0_i32_0 : i32, i32
  }
  func.func @transform_5(%arg0: i32) -> (i32, i32) {
    %c0_i32 = arith.constant 0 : i32
    %c0_i32_0 = arith.constant 0 : i32
    %c0_i32_1 = arith.constant 0 : i32
    return %c0_i32, %c0_i32_0 : i32, i32
  }
  func.func @transform_6(%arg0: i32) -> (i32, i32) {
    %c0_i32 = arith.constant 0 : i32
    %c0_i32_0 = arith.constant 0 : i32
    %c0_i32_1 = arith.constant 0 : i32
    return %c0_i32, %c0_i32_0 : i32, i32
  }
  func.func @transform_7(%arg0: i32) -> (i32, i32, i32) {
    %c0_i32 = arith.constant 0 : i32
    %c0_i32_0 = arith.constant 0 : i32
    %c0_i32_1 = arith.constant 0 : i32
    return %arg0, %c0_i32, %c0_i32_0 : i32, i32, i32
  }
}

</mosaic_0001>

<bundles_post_ra>
// kernel: aligned_module_forward.1
= control target key start
LH: loop header
LB: loop body
LE: loop exit
PB: predicated region body
PF: predicated region fallthrough
CT: control target
= control target key end

     0   :  { %s1439_s24 = smov 0   ;;  %s1904_s0 = inlined_call_operand.vmem [shape: f32[2,4,64], index: 0, kind: input, shape index: {}]   ;;  %s1905_s1 = inlined_call_operand.vmem [shape: f32[2,4,342], index: 1, kind: input, shape index: {}]   ;;  %s1906_s2 = inlined_call_operand.vmem [shape: f32[8,4], index: 2, kind: input, shape index: {}]   ;;  %s1907_s3 = inlined_call_operand.vmem [shape: f32[8,4], index: 3, kind: input, shape index: {}]   ;;  %s1908_s4 = inlined_call_operand.vmem [shape: f32[64,342], index: 4, kind: input, shape index: {}]   ;;  %s1909_s5 = inlined_call_operand.vmem [shape: f32[2,144], index: 5, kind: input, shape index: {}]   ;;  %s1910_s6 = inlined_call_operand.vmem [shape: f32[2,288], index: 6, kind: input, shape index: {}]   ;;  %s1911_s7 = inlined_call_operand.vmem [shape: f32[2,4,288], index: 7, kind: output, shape index: {}]  }
   0x1 LB: > { %s1202_s25 = sadd.s32 4294967295, %s1388_s24   ;;  %p1206_p0 = scmp.ge.s32.totalorder %s1388_s24, 1  ;;  %s1388_s24 = sphi %s1439_s24, %s17_s24  }
   0x2   : > { %p246_p1 = scmp.lt.s32.totalorder %s1388_s24, 3 }
   0x4   : > { %p247_p2 = pnand %p1206_p0, %p246_p1 }
   0x5   : > { %p282_p3 = scmp.lt.s32.totalorder (!%p247_p2), %s1202_s25, 1  ;;  %s1390_s29 = smov (!%p247_p2), 108  }
   0x6   : > { %250 = sbr.rel (%p247_p2) target bundleno = 787 (0x313), region = 48  ;;  %s1391_s30 = smov (!%p247_p2), 91  }
   0x7   : > { %s1392_s8 = smov (!%p247_p2), 92   ;;  %s1394_s11 = smov (!%p247_p2), 126  }
   0x8   : > { %s1395_s12 = smov (!%p247_p2), 110   ;;  %s1396_s14 = smov (!%p247_p2), 90  }
   0x9   : > { %s1397_s15 = smov (!%p247_p2), 127  }
   0xb   : > { %v428_v0 = vld [vmem:[%s1908_s4 + $0xb0] sm:$0xff]  ;;  %s1913_s25 = smov (!%p282_p3, %s1202_s25), 1  ;;  %v425_v1 = vld [vmem:[%s1908_s4 + $0x98] sm:$0xff]  ;;  %v422_v2 = vld [vmem:[%s1908_s4 + $0x80] sm:$0xff]  ;;  %vm304_vm0 = vcmask 1043456   ;;  %vm300_vm1 = vcmask 31744  }
   0xc   : > { %462 = vmatpush.msra.mxu1 %v428_v0  ;;  %s1207_s9 = sshll.u32 %s1913_s25, 2  ;;  %s1241_s10 = smul.u32 12, %s1913_s25  ;;  %v299_v3 = vld [vmem:[%s1906_s2] sm:$0xff]  ;;  %v419_v4 = vld [vmem:[%s1908_s4 + $0x68] sm:$0xff]  ;;  %v416_v9 = vld [vmem:[%s1908_s4 + $0x50] sm:$0xff]  ;;  %vm430_vm2 = vcmask 523264  }
   0xd   : > { %s1463_s13 = scalar_lea.vmem %s1904_s0, %s1207_s9  ;;  %v427_v6 = vld [vmem:[%s1908_s4 + $0xa8] sm:$0xff]  ;;  %v424_v10 = vld [vmem:[%s1908_s4 + $0x90] sm:$0xff]  ;;  %v413_v11 = vld [vmem:[%s1908_s4 + $0x38] sm:$0xff]  ;;  %s1393_s9 = smov 109   ;;  %vm673_vm3 = vcmask 736256   ;;  %vm650_vm4 = vcmask 744448  }
   0xe   : > { %463 = vmatpush.msra.mxu1 %v425_v1  ;;  %s290_s20 = scalar_lea.vmem %s1905_s1, %s1241_s10  ;;  %v296_v5 = vld [vmem:[%s1463_s13] sm:$0xf]  ;;  %v421_v12 = vld [vmem:[%s1908_s4 + $0x78] sm:$0xff]  ;;  %v415_v21 = vld [vmem:[%s1908_s4 + $0x48] sm:$0xff]  ;;  %vm627_vm5 = vcmask 752640   ;;  %vm604_vm6 = vcmask 883712  }
   0xf   : > { %v297_v7 = vld [vmem:[%s290_s20] sm:$0xff]  ;;  %v298_v8 = vld [vmem:[%s290_s20 + $0x8] sm:$0xf]  ;;  %1210 = vmatpush.msk.msra.mxu0 %vm304_vm0, %v296_v5  ;;  %v429_v20 = vld [vmem:[%s1908_s4 + $0xb8] sm:$0xff]  ;;  %vm581_vm7 = vcmask 891904   ;;  %vm558_vm8 = vcmask 900096   ;;  %s295_s20 = scalar_lea.vmem %s1911_s7, %s1241_s10 }
  0x10   : > { %464 = vmatpush.msra.mxu1 %v422_v2  ;;  %331 = vst [vmem:[#allocation1] ss:$2 sm:$0xff] %v297_v7  ;;  %1211 = vmatmul.msk.f32.vlgmr.msra.gmra.mxu0 %vm300_vm1, %v299_v3  ;;  %v410_v13 = vld [vmem:[%s1908_s4 + $0x20] sm:$0xff]  ;;  %v412_v23 = vld [vmem:[%s1908_s4 + $0x30] sm:$0xff]  ;;  %v423_v24 = vld [vmem:[%s1908_s4 + $0x88] sm:$0xff]  ;;  %vm535_vm9 = vcmask 1031168  }
  0x11   : > { %333 = vst [vmem:[#allocation1 + $0x10] ss:$2 sm:$0xff] %v298_v8  ;;  %442 = vmatpush.msrb.mxu0 %v427_v6  ;;  %v418_v14 = vld [vmem:[%s1908_s4 + $0x60] sm:$0xff]  ;;  %v409_v25 = vld [vmem:[%s1908_s4 + $0x18] sm:$0xff]  ;;  %v420_v26 = vld [vmem:[%s1908_s4 + $0x70] sm:$0xff]  ;;  %vm690_vm10 = vcmask 130048  }
  0x12   : > { %465 = vmatpush.msra.mxu1 %v419_v4  ;;  %v328_v15 = vld [vmem:[%s1907_s3] sm:$0xff]  ;;  %v417_v27 = vld [vmem:[%s1908_s4 + $0x58] sm:$0xff]  ;;  %v411_v29 = vld [vmem:[%s1908_s4 + $0x28] sm:$0xff]  ;;  %vm512_vm11 = vcmask 1039360   ;;  %vm822_vm12 = vcmask 1041408  }
  0x13   : > { %443 = vmatpush.msrb.mxu0 %v424_v10  ;;  %v684_v16 = vld [vmem:[%s1909_s5] sm:$0xf]  ;;  %v407_v31 = vld [vmem:[%s1908_s4 + $0x8] sm:$0xff]  ;;  %v408_v32 = vld [vmem:[%s1908_s4 + $0x10] sm:$0xff] }
  0x14   : > { %466 = vmatpush.msra.mxu1 %v416_v9  ;;  %v426_v22 = vld [vmem:[%s1908_s4 + $0xa0] sm:$0xff] }
  0x15   : > { %444 = vmatpush.msrb.mxu0 %v421_v12  ;;  %v414_v28 = vld [vmem:[%s1908_s4 + $0x40] sm:$0xff] }
  0x16   : > { %467 = vmatpush.msra.mxu1 %v413_v11  ;;  %v406_v30 = vld [vmem:[%s1908_s4] sm:$0xff] }
  0x17   : > { %v334_v17 = vld.sshfl [vmem:[#allocation1] sm:$0xff pattern:$0x75316420]  ;;  %v335_v18 = vld.sshfl [vmem:[#allocation1 + $0x8] sm:$0xff pattern:$0x75316420]  ;;  %445 = vmatpush.msrb.mxu0 %v418_v14 }
  0x18   : > { %468 = vmatpush.msra.mxu1 %v410_v13  ;;  %1212 = vmatpush.msk.msra.mxu2 %vm304_vm0, %v334_v17  ;;  %v336_v19 = vld.sshfl [vmem:[#allocation1 + $0x10] sm:$0xff pattern:$0x75316420] }
  0x19   : > { %1213 = vmatmul.msk.f32.vlgmr.msra.gmra.mxu2 %vm300_vm1, %v328_v15  ;;  %1216 = vmatpush.msk.msra.mxu3 %vm304_vm0, %v336_v19  ;;  %686 = vst [vmem:[#allocation1] ss:$4 sm:$0xff] %v684_v16 }
  0x1a   : > { %1214 = vmatpush.msk.msrb.mxu2 %vm304_vm0, %v335_v18  ;;  %1217 = vmatmul.msk.f32.vlgmr.msra.gmra.mxu3 %vm300_vm1, %v328_v15 }
  0x1b   : > { %446 = vmatpush.msrb.mxu0 %v415_v21  ;;  %469 = vmatpush.msra.mxu1 %v407_v31 }
  0x1c   : > { %482 = vmatpush.msra.mxu2 %v429_v20 }
  0x1d   : > { %447 = vmatpush.msrb.mxu0 %v412_v23 }
  0x1e   : > { %483 = vmatpush.msra.mxu2 %v426_v22 }
  0x1f   : > { %448 = vmatpush.msrb.mxu0 %v409_v25 }
  0x20   : > { %484 = vmatpush.msra.mxu2 %v423_v24 }
  0x21   : > { %1215 = vmatmul.msk.f32.vlgmr.msrb.gmra.mxu2 %vm300_vm1, %v328_v15  ;;  %449 = vmatpush.msrb.mxu0 %v406_v30 }
  0x22   : > { %485 = vmatpush.msra.mxu2 %v420_v26 }
  0x24   : > { %486 = vmatpush.msra.mxu2 %v417_v27 }
  0x26   : > { %487 = vmatpush.msra.mxu2 %v414_v28 }
  0x28   : > { %488 = vmatpush.msra.mxu2 %v411_v29 }
  0x2a   : > { %489 = vmatpush.msra.mxu2 %v408_v32 }
  0x8d   : > { %v325_v33 = vpop.f32.mrf.mxu0 }
  0x8e   : > { %1218 = vmatmul.msk.f32.vlgmr.msrb.gmra.mxu0 %vm430_vm2, %v325_v33  ;;  %1219 = vmatmul.msk.f32.vlgmr.msra.gmra.mxu1 %vm430_vm2, %v325_v33 }
  0x8f   : > { %1220 = vmatmul.msk.f32.vlgmr.msra.gmra.mxu2 %vm430_vm2, %v325_v33 }
  0x9c   : > { %v1554_v34 = vpop.f32.mrf.mxu2 }
  0x9d   : > { %v1564_v37 = vpop.f32.mrf.mxu3 }
  0xa4   : > { %v1556_v35 = vpop.f32.mrf.mxu2 }
  0xa5   : > { %v1271_v36 = vpack.i.bf16 %v1556_v35, %v1554_v34  ;;  %v1286_v38 = vpack.i.bf16 %v1564_v37, %v1556_v35 }
  0xa7   : > { %1272 = vrot.lane.b32.xlu2 %v1271_v36, %s1390_s29  ;;  %1262 = vrot.lane.b32.xlu0 %v1271_v36, %s1391_s30 }
  0xa8   : > { %1267 = vrot.lane.b32.xlu1 %v1271_v36, %s1392_s8 }
  0xaf   : > { %1277 = vrot.lane.b32.xlu2 %v1271_v36, %s1393_s9  ;;  %1292 = vrot.lane.b32.xlu0 %v1271_v36, %s1394_s11 }
  0xb7   : > { %1282 = vrot.lane.b32.xlu2 %v1271_v36, %s1395_s12 }
  0xbf   : > { %1287 = vrot.lane.b32.xlu2 %v1286_v38, %s1396_s14 }
 0x101   : > { %v1584_v45 = vpop.permute.xlu2 %1272 }
 0x102   : > { %v1275_v9 = vunpack.i.h.bf16 %v1584_v45  ;;  %v1274_v10 = vunpack.i.l.bf16 %v1584_v45 }
 0x104   : > { %v607_v19 = vsel %vm604_vm6, %v1274_v10, %v1275_v9 }
 0x109   : > { %v1588_v46 = vpop.permute.xlu2 %1277 }
 0x10a   : > { %v1280_v17 = vunpack.i.h.bf16 %v1588_v46  ;;  %v1279_v18 = vunpack.i.l.bf16 %v1588_v46 }
 0x10b   : > { %v1568_v39 = vpop.f32.mrf.mxu0  ;;  %v1570_v40 = vpop.f32.mrf.mxu1 }
 0x10c   : > { %v1306_v41 = vpack.i.bf16 %v1570_v40, %v1568_v39  ;;  %v1366_v48 = vpack.i.bf16 %v1568_v39, %v1554_v34  ;;  %v584_v25 = vsel %vm581_vm7, %v1279_v18, %v1280_v17 }
 0x10e   : > { %1307 = vrot.lane.b32.xlu1 %v1306_v41, %s1390_s29  ;;  %1302 = vrot.lane.b32.xlu2 %v1306_v41, %s1392_s8 }
 0x10f   : > { %1297 = vrot.lane.b32.xlu0 %v1306_v41, %s1391_s30 }
 0x111   : > { %v1590_v47 = vpop.permute.xlu2 %1282 }
 0x112   : > { %v1576_v42 = vpop.f32.mrf.mxu2  ;;  %v1285_v23 = vunpack.i.h.bf16 %v1590_v47  ;;  %v1284_v24 = vunpack.i.l.bf16 %v1590_v47 }
 0x113   : > { %v1356_v43 = vpack.i.bf16 %v1576_v42, %v1570_v40  ;;  %v1326_v44 = vpack.i.bf16 %v1576_v42, %v1564_v37 }
 0x114   : > { %v561_v33 = vsel %vm558_vm8, %v1284_v24, %v1285_v23 }
 0x116   : > { %1312 = vrot.lane.b32.xlu1 %v1306_v41, %s1393_s9  ;;  %1357 = vrot.lane.b32.xlu2 %v1356_v43, %s1396_s14 }
 0x117   : > { %1327 = vrot.lane.b32.xlu0 %v1326_v44, %s1392_s8 }
 0x119   : > { %v1596_v49 = vpop.permute.xlu2 %1287  ;;  %v1603_v53 = vpop.permute.xlu0 %1262 }
 0x11a   : > { %v1290_v50 = vunpack.i.h.bf16 %v1596_v49  ;;  %v1289_v51 = vunpack.i.l.bf16 %v1596_v49  ;;  %v1265_v54 = vunpack.i.h.bf16 %v1603_v53  ;;  %v1264_v55 = vunpack.i.l.bf16 %v1603_v53  ;;  %v1619_v62 = vpop.permute.xlu1 %1267 }
 0x11b   : > { %v1270_v2 = vunpack.i.h.bf16 %v1619_v62  ;;  %v1269_v3 = vunpack.i.l.bf16 %v1619_v62 }
 0x11c   : > { %v677_v52 = vsel %vm673_vm3, %v1289_v51, %v1290_v50  ;;  %v653_v56 = vsel %vm650_vm4, %v1264_v55, %v1265_v54 }
 0x11d   : > { %767 = vmatpush.msrb.mxu2 %v677_v52  ;;  %693 = vmatpush.msrb.mxu3 %v653_v56  ;;  %v630_v11 = vsel %vm627_vm5, %v1269_v3, %v1270_v2 }
 0x11e   : > { %1317 = vrot.lane.b32.xlu1 %v1306_v41, %s1395_s12  ;;  %1362 = vrot.lane.b32.xlu2 %v1326_v44, %s1394_s11 }
 0x11f   : > { %1332 = vrot.lane.b32.xlu0 %v1326_v44, %s1390_s29 }
 0x121   : > { %v1621_v63 = vpop.permute.xlu0 %1292 }
 0x122   : > { %v1295_v31 = vunpack.i.h.bf16 %v1621_v63  ;;  %v1294_v32 = vunpack.i.l.bf16 %v1621_v63 }
 0x124   : > { %v538_v38 = vsel %vm535_vm9, %v1294_v32, %v1295_v31 }
 0x126   : > { %1322 = vrot.lane.b32.xlu1 %v1326_v44, %s1391_s30  ;;  %1377 = vrot.lane.b32.xlu2 %v1326_v44, %s1397_s15 }
 0x127   : > { %1337 = vrot.lane.b32.xlu0 %v1326_v44, %s1393_s9 }
 0x12e   : > { %1347 = vrot.lane.b32.xlu1 %v1271_v36, %s1397_s15 }
 0x12f   : > { %1342 = vrot.lane.b32.xlu0 %v1306_v41, %s1394_s11 }
 0x136   : > { %1352 = vrot.lane.b32.xlu1 %v1326_v44, %s1395_s12 }
 0x137   : > { %1367 = vrot.lane.b32.xlu0 %v1366_v48, %s1396_s14 }
 0x13e   : > { %1372 = vrot.lane.b32.xlu1 %v1306_v41, %s1397_s15 }
 0x168   : > { %v1610_v57 = vpop.permute.xlu2 %1302 }
 0x169   : > { %v1305_v6 = vunpack.i.h.bf16 %v1610_v57  ;;  %v1304_v7 = vunpack.i.l.bf16 %v1610_v57 }
 0x16b   : > { %v628_v15 = vsel %vm627_vm5, %v1304_v7, %v1305_v6 }
 0x170   : > { %v1612_v58 = vpop.permute.xlu2 %1357 }
 0x171   : > { %v1360_v59 = vunpack.i.h.bf16 %v1612_v58  ;;  %v1359_v60 = vunpack.i.l.bf16 %v1612_v58 }
 0x173   : > { %v675_v61 = vsel %vm673_vm3, %v1359_v60, %v1360_v59 }
 0x174   : > { %768 = vmatpush.msrb.mxu2 %v675_v61 }
 0x176   : > { %807 = vmatpush.msra.mxu2 %v1290_v50 }
 0x178   : > { %808 = vmatpush.msra.mxu2 %v1360_v59  ;;  %v688_v59 = vld.sshfl [vmem:[#allocation1 + $0x8] sm:$0xff pattern:$0x73625140]  ;;  %v1713_v57 = vpop.permute.xlu2 %1362 }
 0x179   : > { %1222 = vmatmul.msk.f32.vlgmr.msrb.gmra.mxu2 %vm690_vm10, %v688_v59  ;;  %v1364_v24 = vunpack.i.l.bf16 %v1713_v57 }
 0x17b   : > { %v539_v49 = vsel %vm535_vm9, %v1295_v31, %v1364_v24  ;;  %v687_v31 = vld.sshfl [vmem:[#allocation1] sm:$0xff pattern:$0x73625140] }
 0x180   : > { %v1623_v0 = vpop.permute.xlu1 %1307  ;;  %v1378_v47 = vpop.permute.xlu2 %1377 }
 0x181   : > { %v1298_v1 = vpop.permute.xlu0 %1297  ;;  %v1310_v12 = vunpack.i.h.bf16 %v1623_v0  ;;  %v1309_v13 = vunpack.i.l.bf16 %v1623_v0  ;;  %1223 = vmatmul.msk.f32.vlgmr.msra.gmra.mxu2 %vm690_vm10, %v688_v59  ;;  %v1379_v58 = vunpack.i.l.bf16 %v1378_v47 }
 0x182   : > { %v1300_v4 = vunpack.i.h.bf16 %v1298_v1  ;;  %v1299_v5 = vunpack.i.l.bf16 %v1298_v1 }
 0x183   : > { %v605_v22 = vsel %vm604_vm6, %v1309_v13, %v1310_v12 }
 0x184   : > { %v651_v8 = vsel %vm650_vm4, %v1299_v5, %v1300_v4 }
 0x185   : > { %694 = vmatpush.msrb.mxu3 %v651_v8 }
 0x187   : > { %695 = vmatpush.msrb.mxu3 %v630_v11 }
 0x188   : > { %v1637_v14 = vpop.permute.xlu1 %1312 }
 0x189   : > { %v1642_v16 = vpop.permute.xlu0 %1327  ;;  %696 = vmatpush.msrb.mxu3 %v628_v15  ;;  %v1315_v20 = vunpack.i.h.bf16 %v1637_v14  ;;  %v1314_v21 = vunpack.i.l.bf16 %v1637_v14 }
 0x18a   : > { %v1329_v50 = vunpack.i.l.bf16 %v1642_v16  ;;  %v1330_v55 = vunpack.i.h.bf16 %v1642_v16 }
 0x18b   : > { %697 = vmatpush.msrb.mxu3 %v607_v19  ;;  %v582_v27 = vsel %vm581_vm7, %v1314_v21, %v1315_v20 }
 0x18c   : > { %v631_v53 = vsel %vm627_vm5, %v1270_v2, %v1329_v50 }
 0x18d   : > { %698 = vmatpush.msrb.mxu3 %v605_v22 }
 0x18f   : > { %699 = vmatpush.msrb.mxu3 %v584_v25  ;;  %v1365_v25 = vunpack.i.h.bf16 %v1713_v57 }
 0x190   : > { %v1659_v26 = vpop.permute.xlu1 %1317 }
 0x191   : > { %v1320_v28 = vunpack.i.h.bf16 %v1659_v26  ;;  %v1319_v29 = vunpack.i.l.bf16 %v1659_v26  ;;  %v1666_v30 = vpop.permute.xlu0 %1332  ;;  %700 = vmatpush.msrb.mxu3 %v582_v27 }
 0x192   : > { %v1334_v61 = vunpack.i.l.bf16 %v1666_v30  ;;  %v1335_v1 = vunpack.i.h.bf16 %v1666_v30 }
 0x193   : > { %701 = vmatpush.msrb.mxu3 %v561_v33  ;;  %v559_v36 = vsel %vm558_vm8, %v1319_v29, %v1320_v28 }
 0x194   : > { %v608_v2 = vsel %vm604_vm6, %v1275_v9, %v1334_v61  ;;  %v606_v13 = vsel %vm604_vm6, %v1310_v12, %v1335_v1  ;;  %vm988_vm6 = vcmask 1046528  }
 0x195   : > { %702 = vmatpush.msrb.mxu3 %v559_v36 }
 0x197   : > { %703 = vmatpush.msrb.mxu3 %v538_v38 }
 0x198   : > { %v1679_v41 = vpop.permute.xlu1 %1322 }
 0x199   : > { %v1325_v43 = vunpack.i.h.bf16 %v1679_v41  ;;  %v1324_v44 = vunpack.i.l.bf16 %v1679_v41  ;;  %v1683_v48 = vpop.permute.xlu0 %1337 }
 0x19a   : > { %v1339_v62 = vunpack.i.l.bf16 %v1683_v48 }
 0x19b   : > { %v654_v52 = vsel %vm650_vm4, %v1265_v54, %v1324_v44  ;;  %v652_v56 = vsel %vm650_vm4, %v1300_v4, %v1325_v43  ;;  %v629_v4 = vsel %vm627_vm5, %v1305_v6, %v1330_v55  ;;  %v1340_v6 = vunpack.i.h.bf16 %v1683_v48 }
 0x19c   : > { %733 = vmatpush.msrb.mxu1 %v654_v52  ;;  %v585_v45 = vsel %vm581_vm7, %v1280_v17, %v1339_v62 }
 0x19d   : > { %v583_v0 = vsel %vm581_vm7, %v1315_v20, %v1340_v6  ;;  %vm983_vm7 = vcmask 1046534  }
 0x19e   : > { %734 = vmatpush.msrb.mxu1 %v652_v56 }
 0x1a0   : > { %v1348_v54 = vpop.permute.xlu1 %1347  ;;  %735 = vmatpush.msrb.mxu1 %v631_v53 }
 0x1a1   : > { %v1343_v3 = vpop.permute.xlu0 %1342  ;;  %v1350_v5 = vunpack.i.h.bf16 %v1348_v54  ;;  %v1349_v7 = vunpack.i.l.bf16 %v1348_v54 }
 0x1a2   : > { %v1345_v8 = vunpack.i.h.bf16 %v1343_v3  ;;  %v1344_v10 = vunpack.i.l.bf16 %v1343_v3  ;;  %736 = vmatpush.msrb.mxu1 %v629_v4 }
 0x1a3   : > { %v515_v15 = vsel %vm512_vm11, %v1349_v7, %v1350_v5  ;;  %v516_v63 = vsel %vm512_vm11, %v1350_v5, %v1379_v58 }
 0x1a4   : > { %v536_v11 = vsel %vm535_vm9, %v1344_v10, %v1345_v8  ;;  %737 = vmatpush.msrb.mxu1 %v608_v2  ;;  %v537_v27 = vsel %vm535_vm9, %v1345_v8, %v1365_v25 }
 0x1a5   : > { %704 = vmatpush.msrb.mxu3 %v536_v11 }
 0x1a6   : > { %738 = vmatpush.msrb.mxu1 %v606_v13 }
 0x1a7   : > { %705 = vmatpush.msrb.mxu3 %v515_v15 }
 0x1a8   : > { %v1353_v9 = vpop.permute.xlu1 %1352  ;;  %739 = vmatpush.msrb.mxu1 %v585_v45 }
 0x1a9   : > { %v1355_v18 = vunpack.i.h.bf16 %v1353_v9  ;;  %v1354_v19 = vunpack.i.l.bf16 %v1353_v9  ;;  %v1368_v21 = vpop.permute.xlu0 %1367 }
 0x1aa   : > { %v1370_v12 = vunpack.i.h.bf16 %v1368_v21  ;;  %v1369_v22 = vunpack.i.l.bf16 %v1368_v21  ;;  %740 = vmatpush.msrb.mxu1 %v583_v0 }
 0x1ab   : > { %v562_v46 = vsel %vm558_vm8, %v1285_v23, %v1354_v19  ;;  %v560_v14 = vsel %vm558_vm8, %v1320_v28, %v1355_v18  ;;  %v1380_v28 = vunpack.i.h.bf16 %v1378_v47  ;;  %vm978_vm8 = vcmask 1045509  }
 0x1ac   : > { %v676_v17 = vsel %vm673_vm3, %v1369_v22, %v1289_v51  ;;  %741 = vmatpush.msrb.mxu1 %v562_v46  ;;  %v674_v20 = vsel %vm673_vm3, %v1370_v12, %v1359_v60 }
 0x1ad   : > { %727 = vmatpush.msra.mxu0 %v676_v17 }
 0x1ae   : > { %742 = vmatpush.msrb.mxu1 %v560_v14 }
 0x1af   : > { %728 = vmatpush.msra.mxu0 %v674_v20 }
 0x1b0   : > { %v1373_v51 = vpop.permute.xlu1 %1372  ;;  %743 = vmatpush.msrb.mxu1 %v539_v49  ;;  %1221 = vmatmul.msk.f32.vlgmr.msra.gmra.mxu0 %vm690_vm10, %v688_v59  ;;  %vm990_vm10 = vcmask 1046529  }
 0x1b1   : > { %773 = vmatpush.msrb.mxu0 %v1324_v44  ;;  %v1375_v23 = vunpack.i.h.bf16 %v1373_v51  ;;  %v1374_v26 = vunpack.i.l.bf16 %v1373_v51 }
 0x1b2   : > { %744 = vmatpush.msrb.mxu1 %v537_v27 }
 0x1b3   : > { %774 = vmatpush.msrb.mxu0 %v1325_v43  ;;  %v513_v60 = vsel %vm512_vm11, %v1374_v26, %v1375_v23  ;;  %v514_v29 = vsel %vm512_vm11, %v1375_v23, %v1380_v28 }
 0x1b4   : > { %706 = vmatpush.msrb.mxu3 %v513_v60  ;;  %745 = vmatpush.msrb.mxu1 %v516_v63 }
 0x1b5   : > { %775 = vmatpush.msrb.mxu0 %v1329_v50 }
 0x1b6   : > { %707 = vmatpush.msrb.mxu3 %v1554_v34  ;;  %746 = vmatpush.msrb.mxu1 %v514_v29 }
 0x1b7   : > { %776 = vmatpush.msrb.mxu0 %v1330_v55  ;;  %v832_v55 = vlaneseq }
 0x1b8   : > { %708 = vmatpush.msrb.mxu3 %v1568_v39  ;;  %747 = vmatpush.msrb.mxu1 %v1556_v35 }
 0x1b9   : > { %777 = vmatpush.msrb.mxu0 %v1334_v61  ;;  %709 = vmatmul.f32.vlgmr.msrb.gmra.mxu3 %v687_v31  ;;  %v1774_v53 = vshrl.u32 %v832_v55, 7 }
 0x1ba   : > { %748 = vmatpush.msrb.mxu1 %v1570_v40 }
 0x1bb   : > { %778 = vmatpush.msrb.mxu0 %v1335_v1  ;;  %749 = vmatmul.f32.vlgmr.msrb.gmra.mxu1 %v687_v31 }
 0x1bd   : > { %779 = vmatpush.msrb.mxu0 %v1339_v62 }
 0x1bf   : > { %780 = vmatpush.msrb.mxu0 %v1340_v6 }
 0x1c1   : > { %781 = vmatpush.msrb.mxu0 %v1354_v19  ;;  %v1398_v19 = vmov 0.0  }
 0x1c3   : > { %782 = vmatpush.msrb.mxu0 %v1355_v18 }
 0x1c5   : > { %783 = vmatpush.msrb.mxu0 %v1364_v24 }
 0x1c7   : > { %784 = vmatpush.msrb.mxu0 %v1365_v25 }
 0x1c9   : > { %785 = vmatpush.msrb.mxu0 %v1379_v58 }
 0x1cb   : > { %786 = vmatpush.msrb.mxu0 %v1380_v28 }
 0x1cd   : > { %787 = vmatpush.msrb.mxu0 %v1564_v37  ;;  %v813_v37 = vld [vmem:[%s1910_s6] sm:$0x3f] }
 0x1cf   : > { %788 = vmatpush.msrb.mxu0 %v1576_v42 }
 0x1d0   : > { %789 = vmatmul.f32.vlgmr.msrb.gmra.mxu0 %v687_v31 }
 0x1fc   : > { %v770_v34 = vpop.f32.mrf.mxu2 }
 0x204   : > { %v810_v33 = vpop.f32.mrf.mxu2 }
 0x22d   : > { %v730_v35 = vpop.f32.mrf.mxu0 }
 0x238   : > { %v750_v39 = vpop.f32.mrf.mxu1 }
 0x239   : > { %v771_v16 = vadd.f32 %v770_v34, %v750_v39 }
 0x23b   : > { %v815_v40 = vmul.f32 0.25, %v771_v16 }
 0x23c   : > { %v710_v30 = vpop.f32.mrf.mxu3 }
 0x23d   : > { %v731_v32 = vadd.f32 %v730_v35, %v710_v30  ;;  %v820_v41 = vrot.slane %v815_v40, 6 }
 0x23f   : > { %v814_v43 = vmul.f32 0.25, %v731_v32 }
 0x241   : > { %v823_v48 = vsel %vm822_vm12, %v814_v43, %v820_v41 }
 0x24d   : > { %v790_v36 = vpop.f32.mrf.mxu0 }
 0x24e   : > { %v811_v38 = vadd.f32 %v810_v33, %v790_v36 }
 0x250   : > { %v816_v44 = vmul.f32 0.25, %v811_v38 }
 0x252   : > { %v821_v42 = vrot.slane %v816_v44, 4 }
 0x254   : > { %v824_v50 = vsel %vm304_vm0, %v823_v48, %v821_v42 }
 0x255   : > { %v826_v52 = vadd.f32 %v824_v50, %v813_v37 }
 0x257   : > { %v827_v56 = vfloor.f32 %v826_v52 }
 0x259   : > { %v1772_v59 = vsub.f32 %v826_v52, %v827_v56  ;;  %v1243_v61 = vcvt.f32.s32 %v827_v56 }
 0x25b   : > { %v1777_v54 = vsub.f32 1.0, %v1772_v59  ;;  %v1779_v1 = vadd.s32 1, %v1243_v61  ;;  %v834_v3 = vperm.slane %v1243_v61, 1  ;;  %v835_v4 = vperm.slane %v1243_v61, 3 }
 0x25c   : > { %v836_v5 = vperm.slane %v1243_v61, 5  ;;  %v878_v7 = vperm.slane %v1772_v59, 1  ;;  %v879_v8 = vperm.slane %v1772_v59, 3  ;;  %v880_v10 = vperm.slane %v1772_v59, 5 }
 0x25d   : > { %v837_v62 = vperm.slane %v834_v3, 1  ;;  %v838_v2 = vperm.slane %v835_v4, 1  ;;  %v850_v11 = vperm.slane %v1777_v54, 1  ;;  %v851_v57 = vperm.slane %v1777_v54, 3 }
 0x25e   : > { %v839_v6 = vperm.slane %v836_v5, 1  ;;  %v852_v13 = vperm.slane %v1777_v54, 5  ;;  %v862_v15 = vperm.slane %v1779_v1, 1  ;;  %v863_v45 = vperm.slane %v1779_v1, 3 }
 0x25f   : > { %vm840_vm13 = vcmp.eq.s32.totalorder %v1774_v53, %v837_v62  ;;  %vm841_vm14 = vcmp.eq.s32.totalorder %v1774_v53, %v838_v2  ;;  %v856_v9 = vperm.slane %v850_v11, 1  ;;  %v857_v18 = vperm.slane %v851_v57, 1 }
 0x260   : > { %vm842_vm15 = vcmp.eq.s32.totalorder %v1774_v53, %v839_v6  ;;  %v1224_v21 = vsel %vm840_vm13, 1.0, %v1398_v19  ;;  %v1225_v0 = vsel %vm841_vm14, 1.0, %v1398_v19  ;;  %v858_v12 = vperm.slane %v852_v13, 1 }
 0x261   : > { %v1226_v22 = vsel %vm842_vm15, 1.0, %v1398_v19  ;;  %v859_v24 = vmul.f32 %v1224_v21, %v856_v9  ;;  %v860_v46 = vmul.f32 %v1225_v0, %v857_v18  ;;  %v864_v17 = vperm.slane %v1779_v1, 5 }
 0x262   : > { %v861_v14 = vmul.f32 %v1226_v22, %v858_v12  ;;  %v865_v20 = vperm.slane %v862_v15, 1  ;;  %v866_v25 = vperm.slane %v863_v45, 1  ;;  %v884_v47 = vperm.slane %v878_v7, 1 }
 0x263   : > { %v867_v49 = vperm.slane %v864_v17, 1  ;;  %v885_v51 = vperm.slane %v879_v8, 1  ;;  %v886_v23 = vperm.slane %v880_v10, 1  ;;  %v893_v26 = vperm.slane %v1243_v61, 0 }
 0x264   : > { %vm868_vm1 = vcmp.eq.s32.totalorder %v1774_v53, %v865_v20  ;;  %vm869_vm3 = vcmp.eq.s32.totalorder %v1774_v53, %v866_v25  ;;  %v894_v27 = vperm.slane %v1243_v61, 2  ;;  %v895_v58 = vperm.slane %v1243_v61, 4 }
 0x265   : > { %vm870_vm4 = vcmp.eq.s32.totalorder %v1774_v53, %v867_v49  ;;  %v1227_v60 = vsel %vm868_vm1, 1.0, %v1398_v19  ;;  %v1228_v28 = vsel %vm869_vm3, 1.0, %v1398_v19  ;;  %v896_v63 = vperm.slane %v893_v26, 0 }
 0x266   : > { %v1229_v29 = vsel %vm870_vm4, 1.0, %v1398_v19  ;;  %v887_v31 = vmul.f32 %v1227_v60, %v884_v47  ;;  %v888_v34 = vmul.f32 %v1228_v28, %v885_v51  ;;  %v897_v35 = vperm.slane %v894_v27, 0 }
 0x267   : > { %v889_v39 = vmul.f32 %v1229_v29, %v886_v23  ;;  %v898_v16 = vperm.slane %v895_v58, 0  ;;  %vm899_vm5 = vcmp.eq.s32.totalorder %v1774_v53, %v896_v63  ;;  %v908_v30 = vperm.slane %v1777_v54, 0 }
 0x268   : > { %v1804_v40 = vadd.f32 %v887_v31, %v859_v24  ;;  %v891_v32 = vadd.f32 %v888_v34, %v860_v46  ;;  %vm900_vm9 = vcmp.eq.s32.totalorder %v1774_v53, %v897_v35  ;;  %v1230_v33 = vsel %vm899_vm5, 1.0, %v1398_v19 }
 0x269   : > { %v892_v36 = vadd.f32 %v889_v39, %v861_v14  ;;  %vm901_vm11 = vcmp.eq.s32.totalorder %v1774_v53, %v898_v16  ;;  %v1231_v38 = vsel %vm900_vm9, 1.0, %v1398_v19  ;;  %v909_v41 = vperm.slane %v1777_v54, 2 }
 0x26a   : > { %vm973_vm13 = vcmask 1044484   ;;  %v1232_v43 = vsel %vm901_vm11, 1.0, %v1398_v19  ;;  %v910_v44 = vperm.slane %v1777_v54, 4  ;;  %v914_v37 = vperm.slane %v908_v30, 0 }
 0x26b   : > { %v920_v42 = vperm.slane %v1779_v1, 0  ;;  %vm968_vm14 = vcmask 1043459   ;;  %v915_v48 = vperm.slane %v909_v41, 0  ;;  %v921_v50 = vperm.slane %v1779_v1, 2 }
 0x26c   : > { %v922_v52 = vperm.slane %v1779_v1, 4  ;;  %v935_v55 = vperm.slane %v1772_v59, 0  ;;  %v916_v56 = vperm.slane %v910_v44, 0  ;;  %v917_v61 = vmul.f32 %v1230_v33, %v914_v37 }
 0x26d   : > { %v923_v3 = vperm.slane %v920_v42, 0  ;;  %v936_v4 = vperm.slane %v1772_v59, 2  ;;  %v918_v5 = vmul.f32 %v1231_v38, %v915_v48  ;;  %v924_v7 = vperm.slane %v921_v50, 0 }
 0x26e   : > { %v925_v8 = vperm.slane %v922_v52, 0  ;;  %v937_v54 = vperm.slane %v1772_v59, 4  ;;  %v919_v10 = vmul.f32 %v1232_v43, %v916_v56  ;;  %v941_v62 = vperm.slane %v935_v55, 0 }
 0x26f   : > { %vm926_vm15 = vcmp.eq.s32.totalorder %v1774_v53, %v923_v3  ;;  %v942_v2 = vperm.slane %v936_v4, 0  ;;  %vm927_vm1 = vcmp.eq.s32.totalorder %v1774_v53, %v924_v7  ;;  %v1825_v15 = vrot.slane %v891_v32, 7 }
 0x270   : > { %vm928_vm3 = vcmp.eq.s32.totalorder %v1774_v53, %v925_v8  ;;  %v1233_v1 = vsel %vm926_vm15, 1.0, %v1398_v19  ;;  %v943_v11 = vperm.slane %v937_v54, 0  ;;  %v1234_v57 = vsel %vm927_vm1, 1.0, %v1398_v19 }
 0x271   : > { %v1235_v6 = vsel %vm928_vm3, 1.0, %v1398_v19  ;;  %v944_v13 = vmul.f32 %v1233_v1, %v941_v62  ;;  %v945_v59 = vmul.f32 %v1234_v57, %v942_v2  ;;  %v1827_v9 = vrot.slane %v892_v36, 6 }
 0x272   : > { %v946_v45 = vmul.f32 %v1235_v6, %v943_v11  ;;  %vm985_vm4 = vcmask 1045504   ;;  %v989_v53 = vsel %vm988_vm6, %v1825_v15, %v1804_v40  ;;  %v984_v21 = vsel %vm983_vm7, %v1804_v40, %v1825_v15 }
 0x273   : > { %v1829_v18 = vadd.f32 %v944_v13, %v917_v61  ;;  %v979_v19 = vsel %vm978_vm8, %v1804_v40, %v1825_v15  ;;  %v1840_v0 = vadd.f32 %v945_v59, %v918_v5  ;;  %v991_v22 = vsel %vm990_vm10, %v1827_v9, %v989_v53 }
 0x274   : > { %v1842_v12 = vadd.f32 %v946_v45, %v919_v10  ;;  %v986_v24 = vsel %vm985_vm4, %v1827_v9, %v984_v21  ;;  %v992_v46 = vrot.slane %v991_v22, 7  ;;  %vm980_vm5 = vcmask 1046533  }
 0x275   : > { %v987_v17 = vrot.slane %v986_v24, 6  ;;  %v974_v14 = vsel %vm973_vm13, %v1804_v40, %v1825_v15  ;;  %v981_v20 = vsel %vm980_vm5, %v979_v19, %v1827_v9  ;;  %vm975_vm6 = vcmask 1045508  }
 0x276   : > { %v969_v25 = vsel %vm968_vm14, %v1804_v40, %v1825_v15  ;;  %vm970_vm7 = vcmask 1044483   ;;  %v1014_v47 = vperm.slane %v992_v46, 0  ;;  %v1015_v49 = vperm.slane %v992_v46, 1 }
 0x277   : > { %v1016_v51 = vperm.slane %v992_v46, 2  ;;  %v1011_v23 = vperm.slane %v987_v17, 0  ;;  %v1012_v26 = vperm.slane %v987_v17, 1  ;;  %v1013_v27 = vperm.slane %v987_v17, 2 }
 0x278   : > { %v982_v58 = vrot.slane %v981_v20, 5  ;;  %v976_v60 = vsel %vm975_vm6, %v974_v14, %v1827_v9  ;;  %v1062_v28 = vmul.f32 %v1014_v47, %v1829_v18  ;;  %v1063_v63 = vmul.f32 %v1015_v49, %v1840_v0  ;;  %v1381_v47 = vld [vmem:[%s1463_s13] sm:$0xf] }
 0x279   : > { %v1064_v29 = vmul.f32 %v1016_v51, %v1842_v12  ;;  %v1059_v31 = vmul.f32 %v1011_v23, %v1829_v18  ;;  %v1060_v34 = vmul.f32 %v1012_v26, %v1840_v0  ;;  %v1061_v35 = vmul.f32 %v1013_v27, %v1842_v12 }
 0x27a   : > { %v1008_v39 = vperm.slane %v982_v58, 0  ;;  %v1009_v16 = vperm.slane %v982_v58, 1  ;;  %1075 = vmatpush.msrb.mxu2 %v1062_v28  ;;  %1095 = vmatpush.msra.mxu3 %v1063_v63  ;;  %v1010_v30 = vperm.slane %v982_v58, 2  ;;  %v977_v32 = vrot.slane %v976_v60, 4 }
 0x27b   : > { %v971_v33 = vsel %vm970_vm7, %v969_v25, %v1827_v9  ;;  %vm963_vm8 = vcmask 1042434   ;;  %1115 = vmatpush.msra.mxu1 %v1064_v29  ;;  %vm965_vm9 = vcmask 1043458   ;;  %vm958_vm10 = vcmask 1041409  }
 0x27c   : > { %v1056_v36 = vmul.f32 %v1008_v39, %v1829_v18  ;;  %v1057_v38 = vmul.f32 %v1009_v16, %v1840_v0  ;;  %v972_v41 = vrot.slane %v971_v33, 3  ;;  %v964_v43 = vsel %vm963_vm8, %v1804_v40, %v1825_v15  ;;  %1076 = vmatpush.msrb.mxu2 %v1059_v31  ;;  %1096 = vmatpush.msra.mxu3 %v1060_v34 }
 0x27d   : > { %v1058_v44 = vmul.f32 %v1010_v30, %v1842_v12  ;;  %v1005_v37 = vperm.slane %v977_v32, 0  ;;  %v1006_v42 = vperm.slane %v977_v32, 1  ;;  %v1007_v48 = vperm.slane %v977_v32, 2  ;;  %1116 = vmatpush.msra.mxu1 %v1061_v35 }
 0x27e   : > { %v1002_v50 = vperm.slane %v972_v41, 0  ;;  %v1003_v52 = vperm.slane %v972_v41, 1  ;;  %v1004_v55 = vperm.slane %v972_v41, 2  ;;  %1077 = vmatpush.msrb.mxu2 %v1056_v36  ;;  %1097 = vmatpush.msra.mxu3 %v1057_v38  ;;  %v966_v7 = vsel %vm965_vm9, %v964_v43, %v1827_v9 }
 0x27f   : > { %v1053_v56 = vmul.f32 %v1005_v37, %v1829_v18  ;;  %v1054_v61 = vmul.f32 %v1006_v42, %v1840_v0  ;;  %1117 = vmatpush.msra.mxu1 %v1058_v44  ;;  %v1055_v3 = vmul.f32 %v1007_v48, %v1842_v12  ;;  %v967_v8 = vrot.slane %v966_v7, 2 }
 0x280   : > { %v1050_v4 = vmul.f32 %v1002_v50, %v1829_v18  ;;  %v1051_v5 = vmul.f32 %v1003_v52, %v1840_v0  ;;  %v959_v54 = vsel %vm958_vm10, %v1804_v40, %v1825_v15  ;;  %vm960_vm11 = vcmask 1042433  }
 0x281   : > { %1078 = vmatpush.msrb.mxu2 %v1053_v56  ;;  %1098 = vmatpush.msra.mxu3 %v1054_v61  ;;  %vm955_vm13 = vcmask 1040384   ;;  %v1052_v10 = vmul.f32 %v1004_v55, %v1842_v12  ;;  %v961_v62 = vsel %vm960_vm11, %v959_v54, %v1827_v9  ;;  %v999_v1 = vperm.slane %v967_v8, 0 }
 0x282   : > { %1118 = vmatpush.msra.mxu1 %v1055_v3  ;;  %v956_v2 = vsel %vm955_vm13, %v1804_v40, %v1825_v15  ;;  %v1000_v11 = vperm.slane %v967_v8, 1  ;;  %v1001_v57 = vperm.slane %v967_v8, 2  ;;  %v962_v6 = vrot.slane %v961_v62, 1 }
 0x283   : > { %1079 = vmatpush.msrb.mxu2 %v1050_v4  ;;  %1099 = vmatpush.msra.mxu3 %v1051_v5  ;;  %v957_v13 = vsel %vm822_vm12, %v956_v2, %v1827_v9  ;;  %v1047_v59 = vmul.f32 %v999_v1, %v1829_v18  ;;  %vm1133_vm12 = vcmask 257024  }
 0x284   : > { %1119 = vmatpush.msra.mxu1 %v1052_v10  ;;  %v1048_v45 = vmul.f32 %v1000_v11, %v1840_v0  ;;  %v1049_v53 = vmul.f32 %v1001_v57, %v1842_v12  ;;  %v996_v21 = vperm.slane %v962_v6, 0  ;;  %v997_v19 = vperm.slane %v962_v6, 1 }
 0x285   : > { %v998_v22 = vperm.slane %v962_v6, 2  ;;  %v993_v40 = vperm.slane %v957_v13, 0  ;;  %v994_v15 = vperm.slane %v957_v13, 1  ;;  %1080 = vmatpush.msrb.mxu2 %v1047_v59  ;;  %v995_v46 = vperm.slane %v957_v13, 2 }
 0x286   : > { %1100 = vmatpush.msra.mxu3 %v1048_v45  ;;  %v1044_v24 = vmul.f32 %v996_v21, %v1829_v18  ;;  %1120 = vmatpush.msra.mxu1 %v1049_v53  ;;  %v1045_v9 = vmul.f32 %v997_v19, %v1840_v0 }
 0x287   : > { %v1046_v17 = vmul.f32 %v998_v22, %v1842_v12  ;;  %v1041_v14 = vmul.f32 %v993_v40, %v1829_v18  ;;  %v1042_v20 = vmul.f32 %v994_v15, %v1840_v0  ;;  %v1043_v25 = vmul.f32 %v995_v46, %v1842_v12 }
 0x288   : > { %1081 = vmatpush.msrb.mxu2 %v1044_v24  ;;  %1101 = vmatpush.msra.mxu3 %v1045_v9 }
 0x289   : > { %1121 = vmatpush.msra.mxu1 %v1046_v17 }
 0x28a   : > { %1082 = vmatpush.msrb.mxu2 %v1041_v14  ;;  %1102 = vmatpush.msra.mxu3 %v1042_v20 }
 0x28b   : > { %1122 = vmatpush.msra.mxu1 %v1043_v25  ;;  %1237 = vmatmul.msk.f32.vlgmr.msra.gmra.mxu3 %vm430_vm2, %v1381_v47 }
 0x28c   : > { %1236 = vmatmul.msk.f32.vlgmr.msrb.gmra.mxu2 %vm430_vm2, %v1381_v47  ;;  %1238 = vmatmul.msk.f32.vlgmr.msra.gmra.mxu1 %vm430_vm2, %v1381_v47 }
 0x309   : > { %v1124_v18 = vpop.f32.mrf.mxu1 }
 0x30a   : > { %1134 = vst.msk [vmem:[%s295_s20 + $0x8] sm:$0xf] %vm1133_vm12, %v1124_v18 }
 0x30e   : > { %v1104_v0 = vpop.f32.mrf.mxu3 }
 0x30f   : > { %v1084_v12 = vpop.f32.mrf.mxu2  ;;  %v1129_v49 = vrot.slane %v1104_v0, 4 }
 0x311   : > { %v1130_v51 = vsel %vm304_vm0, %v1084_v12, %v1129_v49 }
 0x312   : > { %1132 = vst [vmem:[%s295_s20] sm:$0xff] %v1130_v51 }
 0x313 PF: > { %s17_s24 = sadd.s32 1, %s1388_s24  }
 0x314   : > { %p14_p4 = scmp.ge.s32.totalorder %s17_s24, 4  }
 0x316   :  { %16 = sbr.rel (!%p14_p4) target bundleno = 1 (0x1), region = 82 }

</bundles_post_ra>
